<compile_context>
chip_gen: v5e
topology: v5e:2x2
jax: 0.10.0
libtpu: 0.0.40
codegen_flags: <defaults>
</compile_context>

<pallas_src>
import functools

import jax
import jax.numpy as jnp
from jax import lax
from jax.experimental import pallas as pl
from jax.experimental.pallas import tpu as pltpu


# ---------------------------------------------------------------------------
# Kernel
# ---------------------------------------------------------------------------
def head_kernel(x_ref, wqkv_ref, o_ref, *, head_size, approx_recip):
    # x_ref:    (Bb, T, C)  block of activations (MXU dtype)
    # wqkv_ref: (C, 3H)     fused [Wk | Wq*scale | Wv] weights (MXU dtype)
    # o_ref:    (Bb, T, H)
    Bb, T, C = x_ref.shape
    H = head_size

    # --- fused QKV projection: one batched MXU matmul (scale pre-folded into Wq) ---
    qkv = lax.dot_general(
        x_ref[...], wqkv_ref[...],
        dimension_numbers=(((2,), (0,)), ((), ())),
        preferred_element_type=jnp.float32)            # (Bb, T, 3H) f32
    k = qkv[:, :, 0:H]
    q = qkv[:, :, H:2 * H]
    v = qkv[:, :, 2 * H:3 * H]

    # --- attention logits: contract H axis of q against H axis of k (no k.T) ---
    wei = lax.dot_general(
        q, k,
        dimension_numbers=(((2,), (2,)), ((0,), (0,))),
        preferred_element_type=jnp.float32)            # (Bb, T, T)

    # causal (lower-triangular) mask from 2D iotas, broadcast over the batch block
    row = lax.broadcasted_iota(jnp.int32, (T, T), 0)
    col = lax.broadcasted_iota(jnp.int32, (T, T), 1)
    causal = (row >= col)[None, :, :]                   # (1, T, T) bool
    wei = jnp.where(causal, wei, -jnp.inf)

    # numerically-stable softmax, strictly f32 (diagonal always unmasked -> no NaN rows)
    m = jnp.max(wei, axis=-1, keepdims=True)
    p = jnp.exp(wei - m)
    denom = jnp.sum(p, axis=-1, keepdims=True)
    p = p * pl.reciprocal(denom, approx=approx_recip)

    # --- attention-weighted values (batched matmul on the MXU) ---
    out = lax.dot_general(
        p.astype(x_ref.dtype), v.astype(x_ref.dtype),
        dimension_numbers=(((2,), (1,)), ((0,), (0,))),
        preferred_element_type=jnp.float32)             # (Bb, T, H)
    o_ref[...] = out.astype(o_ref.dtype)


# ---------------------------------------------------------------------------
# Wrapper helpers
# ---------------------------------------------------------------------------
def prepare_qkv_weights(w_key, w_query, w_value, *, mxu_dtype=jnp.float32):
    """Build the fused (C, 3H) weight slab ONCE per parameter set.

    Layout is [Wk | Wq * C**-0.5 | Wv]; folding the attention scale into the
    query projection removes a per-step VPU multiply inside the kernel.
    Weights are stored as (C, head_size), i.e. PyTorch nn.Linear weight
    transposed, so q/k/v = x @ W.
    """
    C = w_key.shape[0]
    scale = float(C) ** -0.5          # matches PyTorch: C ** (-0.5), C = n_embed
    return jnp.concatenate(
        [w_key, w_query * jnp.float32(scale), w_value], axis=1).astype(mxu_dtype)


def _tensorcores_per_chip():
    """Best-effort detection: v7x has 2 TensorCores/chip, v5e/v6e have 1."""
    try:
        info = pltpu.get_tpu_info()
        for attr in ("num_cores", "cores_per_chip", "num_tensorcores"):
            n = getattr(info, attr, None)
            if n:
                return int(n)
    except Exception:
        pass
    try:
        kind = jax.devices()[0].device_kind.lower()
        if "v7" in kind:
            return 2
    except Exception:
        pass
    return 1


def _choose_batch_block(B, T, C, H, itemsize, num_cores,
                        vmem_budget_bytes=8 << 20):
    """Pick Bb: >= num_cores grid blocks (megacore on v7x), capped so the
    monolithic (Bb,T,T) f32 logits + double-buffered x/out blocks fit well
    inside the default scoped VMEM limit."""
    def live_bytes(bb):
        x_blk = 2 * bb * T * C * itemsize          # double-buffered input block
        o_blk = 2 * bb * T * H * 4                 # double-buffered output block
        tmp = 4 * bb * T * T * 4                   # logits / exp / select temporaries
        return x_blk + o_blk + tmp

    bb = max(1, B // max(1, num_cores))
    while bb > 1 and live_bytes(bb) > vmem_budget_bytes:
        bb = pl.cdiv(bb, 2)
    return bb


def head_forward(x, w_qkv, head_size, *, batch_block=None):
    """x: (B, T, C); w_qkv: fused (C, 3*head_size) from prepare_qkv_weights.

    Returns (B, T, head_size) in x.dtype.  The MXU dtype is w_qkv.dtype
    (bf16 recommended on v5e/v6e/v7x); accumulation and softmax are f32.
    """
    B, T, C = x.shape
    H = head_size
    mxu_dtype = w_qkv.dtype
    x_in = x.astype(mxu_dtype)

    cores = _tensorcores_per_chip()
    if batch_block is None:
        batch_block = _choose_batch_block(
            B, T, C, H, jnp.dtype(mxu_dtype).itemsize, cores)
    Bb = max(1, min(int(batch_block), B))

    # pl.cdiv grid + explicit padding (no divisor search; prime/odd B stays efficient)
    num_blocks = pl.cdiv(B, Bb)
    B_pad = num_blocks * Bb
    if B_pad != B:
        x_in = jnp.pad(x_in, ((0, B_pad - B), (0, 0), (0, 0)))

    approx = (mxu_dtype != jnp.float32)   # EUP vrcp on the production (bf16) path
    kernel = functools.partial(head_kernel, head_size=H, approx_recip=approx)

    out = pl.pallas_call(
        kernel,
        out_shape=jax.ShapeDtypeStruct((B_pad, T, H), x.dtype),
        grid_spec=pltpu.PrefetchScalarGridSpec(
            num_scalar_prefetch=0,
            grid=(num_blocks,),
            in_specs=[
                pl.BlockSpec((Bb, T, C), lambda b: (b, 0, 0)),   # x batch-block
                pl.BlockSpec((C, 3 * H), lambda b: (0, 0)),      # fused Wqkv (full)
            ],
            out_specs=pl.BlockSpec((Bb, T, H), lambda b: (b, 0, 0)),
        ),
        compiler_params=pltpu.CompilerParams(
            dimension_semantics=("parallel",)),   # batch blocks shard across TCs (v7x)
    )(x_in, w_qkv)

    return out[:B] if B_pad != B else out


# ---------------------------------------------------------------------------
# Pure-JAX reference (mirrors the PyTorch forward, eval mode)
# ---------------------------------------------------------------------------
def reference_head(x, w_key, w_query, w_value):
    B, T, C = x.shape
    k = x @ w_key
    q = x @ w_query
    v = x @ w_value
    wei = (q @ jnp.swapaxes(k, -2, -1)) * (C ** -0.5)
    tril = jnp.tril(jnp.ones((T, T), dtype=bool))
    wei = jnp.where(tril, wei, -jnp.inf)
    wei = jax.nn.softmax(wei, axis=-1)
    return wei @ v


if __name__ == "__main__":
    # Module hyperparameters (small, consistent with the forward pass)
    B = 2           # batch
    T = 8           # sequence length == block_size
    n_embed = 32    # C
    head_size = 16  # H

    key = jax.random.PRNGKey(0)
    kx, kk, kq, kv = jax.random.split(key, 4)

    x = jax.random.normal(kx, (B, T, n_embed), dtype=jnp.float32)
    # Deterministic weight init (nn.Linear-like scale), stored as (C, H) = weight.T
    wscale = 1.0 / (n_embed ** 0.5)
    w_key = jax.random.uniform(kk, (n_embed, head_size), jnp.float32, -wscale, wscale)
    w_query = jax.random.uniform(kq, (n_embed, head_size), jnp.float32, -wscale, wscale)
    w_value = jax.random.uniform(kv, (n_embed, head_size), jnp.float32, -wscale, wscale)

    ref = reference_head(x, w_key, w_query, w_value)

    # Strict-precision path (f32 MXU inputs): must match reference tightly.
    w_qkv_f32 = prepare_qkv_weights(w_key, w_query, w_value, mxu_dtype=jnp.float32)
    out_f32 = jax.block_until_ready(head_forward(x, w_qkv_f32, head_size))
    assert out_f32.shape == (B, T, head_size)
    assert jnp.allclose(out_f32, ref, atol=1e-5, rtol=1e-5), "f32 mismatch vs reference"

    # Production path (bf16 MXU inputs, f32 softmax): looser bf16-level tolerance.
    w_qkv_bf16 = prepare_qkv_weights(w_key, w_query, w_value, mxu_dtype=jnp.bfloat16)
    out_bf16 = jax.block_until_ready(head_forward(x, w_qkv_bf16, head_size))
    assert out_bf16.shape == (B, T, head_size)
    assert jnp.allclose(out_bf16, ref, atol=3e-2, rtol=3e-2), "bf16 mismatch vs reference"

    print("KERNEL_OK")
</pallas_src>

<mosaic_0001>
module attributes {stable_mosaic.version = 11 : i64} {
  func.func @head_kernel(%arg0: i32, %arg1: memref<2x8x32xf32, #tpu.memory_space<vmem>>, %arg2: memref<32x48xf32, #tpu.memory_space<vmem>>, %arg3: memref<2x8x16xf32, #tpu.memory_space<vmem>>) attributes {dimension_semantics = [#tpu.dimension_semantics<parallel>], iteration_bounds = array<i64: 1>, scalar_prefetch = 0 : i64, scratch_operands = 0 : i64, tpu.core_type = #tpu.core_type<tc>, window_params = [{transform_indices = @transform_0, window_bounds = array<i64: 2, 8, 32>}, {pipeline_mode = #tpu.pipeline_mode<synchronous>, transform_indices = @transform_1, window_bounds = array<i64: 32, 48>}, {transform_indices = @transform_2, window_bounds = array<i64: 2, 8, 16>}]} {
    %c0 = arith.constant 0 : index
    %c0_0 = arith.constant 0 : index
    %c0_1 = arith.constant 0 : index
    %0 = vector.load %arg1[%c0, %c0_0, %c0_1] : memref<2x8x32xf32, #tpu.memory_space<vmem>>, vector<2x8x32xf32>
    %c0_2 = arith.constant 0 : index
    %c0_3 = arith.constant 0 : index
    %1 = vector.load %arg2[%c0_2, %c0_3] : memref<32x48xf32, #tpu.memory_space<vmem>>, vector<32x48xf32>
    %cst = arith.constant dense<0.000000e+00> : vector<2x8x48xf32>
    %2 = tpu.matmul %0, %1, %cst {dimension_numbers = #tpu.dot_dimension_numbers<[2], [0], [0, 1], [1], [0, 0, 0, 1, 1, 1], [], []>} : vector<2x8x32xf32>, vector<32x48xf32>, vector<2x8x48xf32> -> vector<2x8x48xf32>
    %3 = vector.extract_strided_slice %2 {offsets = [0, 0, 0], sizes = [2, 8, 16], strides = [1, 1, 1]} : vector<2x8x48xf32> to vector<2x8x16xf32>
    %4 = vector.extract_strided_slice %2 {offsets = [0, 0, 16], sizes = [2, 8, 16], strides = [1, 1, 1]} : vector<2x8x48xf32> to vector<2x8x16xf32>
    %5 = vector.extract_strided_slice %2 {offsets = [0, 0, 32], sizes = [2, 8, 16], strides = [1, 1, 1]} : vector<2x8x48xf32> to vector<2x8x16xf32>
    %cst_4 = arith.constant dense<0.000000e+00> : vector<2x8x8xf32>
    %6 = tpu.matmul %4, %3, %cst_4 {dimension_numbers = #tpu.dot_dimension_numbers<[2], [2], [1], [1], [0, 0, 0, 1, 1, 1], [0], [0]>} : vector<2x8x16xf32>, vector<2x8x16xf32>, vector<2x8x8xf32> -> vector<2x8x8xf32>
    %7 = tpu.iota {dimensions = array<i32: 0>} : vector<8x8xi32>
    %8 = tpu.iota {dimensions = array<i32: 1>} : vector<8x8xi32>
    %9 = arith.cmpi sge, %7, %8 : vector<8x8xi32>
    %10 = vector.shape_cast %9 : vector<8x8xi1> to vector<1x8x8xi1>
    %cst_5 = arith.constant 0xFF800000 : f32
    %11 = vector.shape_cast %10 : vector<1x8x8xi1> to vector<1x8x8xi1>
    %12 = vector.broadcast %11 : vector<1x8x8xi1> to vector<2x8x8xi1>
    %13 = vector.broadcast %cst_5 : f32 to vector<2x8x8xf32>
    %14 = arith.select %12, %6, %13 : vector<2x8x8xi1>, vector<2x8x8xf32>
    %cst_6 = arith.constant dense<0xFF800000> : vector<2x8xf32>
    %15 = vector.multi_reduction <maximumf>, %14, %cst_6 [2] : vector<2x8x8xf32> to vector<2x8xf32>
    %16 = vector.shape_cast %15 : vector<2x8xf32> to vector<2x8x1xf32>
    %17 = vector.broadcast %16 : vector<2x8x1xf32> to vector<2x8x8xf32>
    %18 = arith.subf %14, %17 : vector<2x8x8xf32>
    %19 = math.exp %18 : vector<2x8x8xf32>
    %cst_7 = arith.constant dense<0.000000e+00> : vector<2x8xf32>
    %20 = vector.multi_reduction <add>, %19, %cst_7 [2] : vector<2x8x8xf32> to vector<2x8xf32>
    %21 = vector.shape_cast %20 : vector<2x8xf32> to vector<2x8x1xf32>
    %22 = tpu.reciprocal %21 : vector<2x8x1xf32> -> vector<2x8x1xf32>
    %23 = vector.broadcast %22 : vector<2x8x1xf32> to vector<2x8x8xf32>
    %24 = arith.mulf %19, %23 : vector<2x8x8xf32>
    %cst_8 = arith.constant dense<0.000000e+00> : vector<2x8x16xf32>
    %25 = tpu.matmul %24, %5, %cst_8 {dimension_numbers = #tpu.dot_dimension_numbers<[2], [1], [1], [2], [0, 0, 0, 1, 1, 2], [0], [0]>} : vector<2x8x8xf32>, vector<2x8x16xf32>, vector<2x8x16xf32> -> vector<2x8x16xf32>
    %c0_9 = arith.constant 0 : index
    %c0_10 = arith.constant 0 : index
    %c0_11 = arith.constant 0 : index
    %26 = vector.load %arg3[%c0_9, %c0_10, %c0_11] : memref<2x8x16xf32, #tpu.memory_space<vmem>>, vector<2x8x16xf32>
    tpu.vector_store %arg3[%c0_9, %c0_10, %c0_11], %25 {strides = array<i32>} : memref<2x8x16xf32, #tpu.memory_space<vmem>>, vector<2x8x16xf32>,
    return
  }
  func.func @transform_0(%arg0: i32) -> (i32, i32, i32) {
    %c0_i32 = arith.constant 0 : i32
    %c0_i32_0 = arith.constant 0 : i32
    %c0_i32_1 = arith.constant 0 : i32
    return %arg0, %c0_i32, %c0_i32_0 : i32, i32, i32
  }
  func.func @transform_1(%arg0: i32) -> (i32, i32) {
    %c0_i32 = arith.constant 0 : i32
    %c0_i32_0 = arith.constant 0 : i32
    %c0_i32_1 = arith.constant 0 : i32
    return %c0_i32, %c0_i32_0 : i32, i32
  }
  func.func @transform_2(%arg0: i32) -> (i32, i32, i32) {
    %c0_i32 = arith.constant 0 : i32
    %c0_i32_0 = arith.constant 0 : i32
    %c0_i32_1 = arith.constant 0 : i32
    return %arg0, %c0_i32, %c0_i32_0 : i32, i32, i32
  }
}

</mosaic_0001>

<bundles_post_ra>
// kernel: tpu_custom_call.1
= control target key start
LH: loop header
LB: loop body
LE: loop exit
PB: predicated region body
PF: predicated region fallthrough
CT: control target
= control target key end

     0   :  { %7 = vsyncpa [#allocation3], 0  ;;  %s420_s0 = inlined_call_operand.hbm [shape: f32[2,8,32], index: 0, kind: input, shape index: {}]   ;;  %s421_s1 = inlined_call_operand.hbm [shape: f32[32,48], index: 1, kind: input, shape index: {}]   ;;  %s422_s2 = inlined_call_operand.hbm [shape: f32[2,8,16], index: 2, kind: output, shape index: {}]  }
   0x1   :  { %8 = vsyncpa [#allocation6], 0 }
   0x2   :  { %9 = vsyncpa [#allocation4], 0  ;;  %s14_s11 = sshll.u32 %s420_s0, 4  ;;  %s368_s12 = smov [#allocation2]   ;;  %s15_s11 = int_to_ptr.hbm [resolvable:$true] %s14_s11 }
   0x3   :  { %s16_s13 = sshll.u32 %s368_s12, 4  ;;  %s27_s16 = sshll.u32 %s421_s1, 4  ;;  %s17_s13 = int_to_ptr.vmem [resolvable:$true] %s16_s13  ;;  %s28_s16 = int_to_ptr.hbm [resolvable:$true] %s27_s16 }
   0x4   :  { %s369_s17 = smov 128   ;;  %s370_s18 = smov 8  }
   0x5   :  { %22 = dma.hbm_to_vmem [thread:$0]  %s15_s11, 256, %s17_s13, [#allocation3], %s369_s17, %s369_s17, %s370_s18  }
   0x6   :  { %s371_s19 = smov [#allocation5]  }
   0x7   :  { %s29_s20 = sshll.u32 %s371_s19, 4  ;;  %s30_s20 = int_to_ptr.vmem [resolvable:$true] %s29_s20 }
   0x8   :  { %35 = dma.hbm_to_vmem [thread:$0]  %s28_s16, 512, %s30_s20, [#allocation6], %s369_s17, %s369_s17, %s370_s18  }
   0x9   :  { %362 = dma.done.wait [#allocation3], 256  }
   0xa   :  { %363 = vsyncadd [#allocation3], 4294967040 }
   0xb   :  { %364 = dma.done.wait [#allocation6], 512  }
   0xc   :  { %365 = vsyncadd [#allocation6], 4294966784  ;;  %v49_v0 = vld [vmem:[#allocation5 + $0x18] sm:$0xff]  ;;  %v48_v1 = vld [vmem:[#allocation5 + $0x10] sm:$0xff]  ;;  %vm50_vm0 = vcmask 261120   ;;  %vm83_vm1 = vcmask 130048   ;;  %v135_v11 = vlaneseq }
   0xd   :  { %69 = vmatpush.msra.mxu0 %v49_v0  ;;  %v47_v2 = vld [vmem:[#allocation5 + $0x8] sm:$0xff]  ;;  %v46_v3 = vld [vmem:[#allocation5] sm:$0xff]  ;;  %v44_v4 = vld [vmem:[#allocation2] sm:$0xff]  ;;  %s372_s0 = smov 112   ;;  %s373_s1 = smov 96   ;;  %vm144_vm3 = vcmask 64512  }
   0xe   :  { %v45_v5 = vld [vmem:[#allocation2 + $0x8] sm:$0xff]  ;;  %v136_v12 = vshrl.u32 %v135_v11, 7  ;;  %v138_v13 = vand.u32 127, %v135_v11  ;;  %s374_s21 = smov [#allocation7]   ;;  %s253_s25 = sshll.u32 %s422_s2, 4  ;;  %s254_s25 = int_to_ptr.hbm [resolvable:$true] %s253_s25 }
   0xf   :  { %70 = vmatpush.msra.mxu0 %v48_v1  ;;  %s251_s22 = sshll.u32 %s374_s21, 4  ;;  %s252_s22 = int_to_ptr.vmem [resolvable:$true] %s251_s22 }
  0x10   :  { %vm139_vm2 = vcmp.ge.s32.totalorder %v136_v12, %v138_v13 }
  0x11   :  { %71 = vmatpush.msra.mxu0 %v47_v2 }
  0x13   :  { %72 = vmatpush.msra.mxu0 %v46_v3 }
  0x14   :  { %267 = vmatmul.msk.f32.vlgmr.msra.gmra.mxu0 %vm50_vm0, %v44_v4 }
  0x1c   :  { %268 = vmatmul.msk.f32.gmra.mxu0 %vm50_vm0, %v45_v5 }
  0x91   :  { %v74_v6 = vpop.f32.mrf.mxu0 }
  0x92   :  { %81 = vrot.lane.b32.xlu0 %v74_v6, %s372_s0  ;;  %269 = vmatpush.xpose.msk.msra.mxu1 %vm83_vm1, %v74_v6 }
  0x99   :  { %v77_v7 = vpop.f32.mrf.mxu0 }
  0x9a   :  { %109 = vrot.lane.b32.xlu0 %v77_v7, %s372_s0  ;;  %271 = vmatpush.xpose.msk.msra.mxu2 %vm83_vm1, %v77_v7 }
  0xa2   :  { %193 = vrot.lane.b32.xlu0 %v74_v6, %s373_s1 }
 0x104   :  { %v82_v8 = vpop.permute.xlu0 %81 }
 0x105   :  { %270 = vmatmul.msk.f32.vlgmr.msra.gmra.mxu1 %vm83_vm1, %v82_v8 }
 0x10c   :  { %v110_v9 = vpop.permute.xlu0 %109 }
 0x10d   :  { %272 = vmatmul.msk.f32.vlgmr.msra.gmra.mxu2 %vm83_vm1, %v110_v9 }
 0x114   :  { %v194_v10 = vpop.permute.xlu0 %193 }
 0x115   :  { %214 = vmatpush.msra.mxu3 %v194_v10 }
 0x182   :  { %v105_v14 = vpop.f32.mrf.mxu1 }
 0x183   :  { %v142_v15 = vsel %vm139_vm2, %v105_v14, -inf }
 0x184   :  { %v145_v16 = vsel %vm144_vm3, %v142_v15, -inf }
 0x185   :  { %146 = vmax.xlane.f32.xlu1 %v145_v16 }
 0x190   :  { %v132_v17 = vpop.f32.mrf.mxu2 }
 0x191   :  { %v143_v18 = vsel %vm139_vm2, %v132_v17, -inf }
 0x192   :  { %v148_v19 = vsel %vm144_vm3, %v143_v18, -inf }
 0x193   :  { %149 = vmax.xlane.f32.xlu1 %v148_v19 }
 0x1ac   :  { %219 = vrot.lane.b32.xlu1 %v77_v7, %s373_s1 }
 0x1f8   :  { %v147_v20 = vpop.xlane.xlu1 %146 }
 0x1f9   :  { %v151_v21 = vsub.f32 %v142_v15, %v147_v20 }
 0x1fb   :  { %v153_v22 = vmul.f32 1.442695, %v151_v21 }
 0x1fd   :  { %282 = vpow2.f32 %v153_v22 }
 0x203   :  { %v283_v23 = vpop.eup %282 }
 0x204   :  { %v157_v24 = vsel %vm144_vm3, %v283_v23, 0.0 }
 0x205   :  { %158 = vadd.xlane.f32.xlu2 %v157_v24 }
 0x206   :  { %v150_v25 = vpop.xlane.xlu1 %149 }
 0x207   :  { %v152_v26 = vsub.f32 %v143_v18, %v150_v25 }
 0x209   :  { %v155_v27 = vmul.f32 1.442695, %v152_v26 }
 0x20b   :  { %284 = vpow2.f32 %v155_v27 }
 0x211   :  { %v285_v28 = vpop.eup %284 }
 0x212   :  { %v160_v29 = vsel %vm144_vm3, %v285_v28, 0.0 }
 0x213   :  { %161 = vadd.xlane.f32.xlu2 %v160_v29 }
 0x21e   :  { %v220_v30 = vpop.permute.xlu1 %219 }
 0x21f   :  { %240 = vmatpush.msrb.mxu3 %v220_v30 }
 0x278   :  { %v159_v31 = vpop.xlane.xlu2 %158 }
 0x279   :  { %286 = vrcp.f32 %v159_v31  ;;  %v174_v35 = vand.u32 2147483648, %v159_v31  ;;  %v172_v37 = vand.u32 2147483647, %v159_v31  ;;  %vm168_vm5 = vweird.f32 %v159_v31 }
 0x27b   :  { %v175_v40 = vor.u32 1.1754944e-38, %v174_v35  ;;  %vm173_vm7 = vcmp.eq.f32.partialorder %v172_v37, 8.507059e+37 }
 0x27f   :  { %v287_v32 = vpop.eup %286 }
 0x280   :  { %v164_v33 = vmul.f32 %v287_v32, %v159_v31  ;;  %vm169_vm4 = vweird.f32 %v287_v32 }
 0x281   :  { %vm170_vm6 = vmor %vm168_vm5, %vm169_vm4 }
 0x282   :  { %v165_v34 = vsub.f32 1.0, %v164_v33 }
 0x284   :  { %v166_v36 = vmul.f32 %v287_v32, %v165_v34 }
 0x286   :  { %v162_v38 = vpop.xlane.xlu2 %161  ;;  %v167_v39 = vadd.f32 %v287_v32, %v166_v36 }
 0x287   :  { %288 = vrcp.f32 %v162_v38  ;;  %v188_v47 = vand.u32 2147483648, %v162_v38  ;;  %v186_v49 = vand.u32 2147483647, %v162_v38  ;;  %vm182_vm9 = vweird.f32 %v162_v38 }
 0x288   :  { %v171_v41 = vsel %vm170_vm6, %v287_v32, %v167_v39 }
 0x289   :  { %v176_v42 = vsel %vm173_vm7, %v175_v40, %v171_v41  ;;  %v189_v51 = vor.u32 1.1754944e-38, %v188_v47  ;;  %vm187_vm11 = vcmp.eq.f32.partialorder %v186_v49, 8.507059e+37 }
 0x28a   :  { %v191_v43 = vmul.f32 %v283_v23, %v176_v42 }
 0x28c   :  { %273 = vmatmul.msk.f32.vlgmr.msra.gmra.mxu3 %vm144_vm3, %v191_v43 }
 0x28d   :  { %v289_v44 = vpop.eup %288 }
 0x28e   :  { %v178_v45 = vmul.f32 %v289_v44, %v162_v38  ;;  %vm183_vm8 = vweird.f32 %v289_v44 }
 0x28f   :  { %vm184_vm10 = vmor %vm182_vm9, %vm183_vm8 }
 0x290   :  { %v179_v46 = vsub.f32 1.0, %v178_v45 }
 0x292   :  { %v180_v48 = vmul.f32 %v289_v44, %v179_v46 }
 0x294   :  { %v181_v50 = vadd.f32 %v289_v44, %v180_v48 }
 0x296   :  { %v185_v52 = vsel %vm184_vm10, %v289_v44, %v181_v50 }
 0x297   :  { %v190_v53 = vsel %vm187_vm11, %v189_v51, %v185_v52 }
 0x298   :  { %v192_v54 = vmul.f32 %v285_v28, %v190_v53 }
 0x29a   :  { %274 = vmatmul.msk.f32.vlgmr.msrb.gmra.mxu3 %vm144_vm3, %v192_v54 }
 0x30f   :  { %v216_v55 = vpop.f32.mrf.mxu3 }
 0x310   :  { %245 = vst.msk [vmem:[#allocation7] sm:$0xff] %vm83_vm1, %v216_v55 }
 0x31d   :  { %v242_v56 = vpop.f32.mrf.mxu3 }
 0x31e   :  { %246 = vst.msk [vmem:[#allocation7 + $0x8] sm:$0xff] %vm83_vm1, %v242_v56 }
 0x31f   :  { %259 = dma.vmem_to_hbm [thread:$0]  %s252_s22, 256, %s254_s25, [#allocation4], %s369_s17, %s369_s17, %s370_s18  }
 0x320   :  { %366 = dma.done.wait [#allocation4], 256  }
 0x321   :  { %367 = vsyncadd [#allocation4], 4294967040 }
 0x322   :  { %264 = vsyncpa [#allocation3], 1 }
 0x323   :  { %265 = vsyncpa [#allocation6], 1 }
 0x324   :  { %266 = vsyncpa [#allocation4], 1 }

</bundles_post_ra>
